<compile_context>
chip_gen: v7x
topology: tpu7x:2x2x1
jax: 0.10.0
libtpu: 0.0.40
codegen_flags: <defaults>
</compile_context>

<pallas_src>
import jax
import jax.numpy as jnp
from jax.experimental import pallas as pl
from jax.experimental.pallas import tpu as pltpu


def _round_up(x, m):
    return ((x + m - 1) // m) * m


def _policy_fwd_kernel(xT_ref, w1_ref, b1_ref, w2_ref, b2_ref, w3_ref, b3_ref,
                       o_ref):
    """One batch tile, batch-on-lanes.

      xT: (S,  TB)    W1: (H1, S)   b1: (H1, 1)
                      W2: (H2, H1)  b2: (H2, 1)
                      W3: (A,  H2)  b3: (A,  1)
      out: (A, TB) f32 = tanh(W3 @ tanh(W2 @ tanh(W1 @ xT + b1) + b2) + b3)
    """
    x = xT_ref[...]
    # MXU matmuls accumulate in f32; bias add + tanh epilogue stays in f32.
    h1 = jnp.tanh(
        jnp.dot(w1_ref[...], x, preferred_element_type=jnp.float32)
        + b1_ref[...])
    h2 = jnp.tanh(
        jnp.dot(w2_ref[...], h1.astype(w2_ref.dtype),
                preferred_element_type=jnp.float32) + b2_ref[...])
    y = jnp.tanh(
        jnp.dot(w3_ref[...], h2.astype(w3_ref.dtype),
                preferred_element_type=jnp.float32) + b3_ref[...])
    o_ref[...] = y.astype(o_ref.dtype)


def policy_forward(states, params, *, block_b=2048, matmul_dtype=jnp.bfloat16):
    """tanh(MLP(states)).  states: (B, state_dim) f32 -> (B, action_dim) f32.

    params: (w1, b1, w2, b2, w3, b3) with w: (in, out), b: (1, out)
            (i.e. transposed relative to torch.nn.Linear.weight).
    """
    w1, b1, w2, b2, w3, b3 = params
    B, S = states.shape
    A = w3.shape[1]

    # Reorient once outside the kernel (cheap XLA transposes of tiny weights).
    w1T = w1.T.astype(matmul_dtype)                    # (H1, S)
    w2T = w2.T.astype(matmul_dtype)                    # (H2, H1)
    w3T = w3.T.astype(matmul_dtype)                    # (A,  H2)
    b1T = b1.reshape(-1, 1).astype(jnp.float32)        # (H1, 1)
    b2T = b2.reshape(-1, 1).astype(jnp.float32)        # (H2, 1)
    b3T = b3.reshape(-1, 1).astype(jnp.float32)        # (A,  1)

    # Batch tile: multiple of 128 (lane-dense), capped so each block stays far
    # under the v7x 32 MiB scoped-VMEM default even with double-buffering.
    TB = min(block_b, _round_up(B, 128))
    B_pad = _round_up(B, TB)

    xT = states.astype(matmul_dtype).T                 # (S, B) batch on lanes
    if B_pad != B:
        xT = jnp.pad(xT, ((0, 0), (0, B_pad - B)))

    grid = (B_pad // TB,)
    full = lambda arr: pl.BlockSpec(arr.shape, lambda i: (0,) * arr.ndim)

    outT = pl.pallas_call(
        _policy_fwd_kernel,
        out_shape=jax.ShapeDtypeStruct((A, B_pad), jnp.float32),
        grid=grid,
        in_specs=[
            pl.BlockSpec((S, TB), lambda i: (0, i)),   # activations: tiled batch
            full(w1T), full(b1T),                      # weights/biases resident
            full(w2T), full(b2T),
            full(w3T), full(b3T),
        ],
        out_specs=pl.BlockSpec((A, TB), lambda i: (0, i)),
        compiler_params=pltpu.CompilerParams(
            dimension_semantics=("parallel",)),        # megacore sharding (v7x)
    )(xT, w1T, b1T, w2T, b2T, w3T, b3T)

    return outT.T[:B]                                  # back to (B, A), drop pad


def init_params(key, state_dim, action_dim, hidden_units=(64, 64)):
    """Deterministic synthetic parameter init (stand-in for build_mlp init)."""
    dims = (state_dim,) + tuple(hidden_units) + (action_dim,)
    params = []
    for i in range(len(dims) - 1):
        key, kw = jax.random.split(key)
        fan_in = dims[i]
        w = jax.random.normal(kw, (dims[i], dims[i + 1]), jnp.float32) / jnp.sqrt(
            jnp.float32(fan_in))
        b = jnp.zeros((1, dims[i + 1]), jnp.float32)
        params += [w, b]
    return tuple(params)


def reference_forward(states, params):
    w1, b1, w2, b2, w3, b3 = params
    h = jnp.tanh(states @ w1 + b1)
    h = jnp.tanh(h @ w2 + b2)
    return jnp.tanh(h @ w3 + b3)


if __name__ == "__main__":
    key = jax.random.PRNGKey(0)
    # B deliberately not a multiple of 128 to exercise padding + a 2-step grid.
    B, STATE_DIM, ACTION_DIM = 200, 16, 8

    key, ks = jax.random.split(key)
    states = jax.random.normal(ks, (B, STATE_DIM), jnp.float32)

    params = init_params(key, STATE_DIM, ACTION_DIM, hidden_units=(64, 64))
    # log_stds parameter of the module (unused in forward):
    log_stds = jnp.zeros((1, ACTION_DIM), jnp.float32)  # noqa: F841
    # TODO(synk): sample()/evaluate_log_pi() (reparameterized sampling, log-prob)
    # are not part of forward() and are not implemented here.

    ref = reference_forward(states, params)

    # f32 matmul path: matches the reference tightly.
    actions_f32 = policy_forward(states, params, block_b=128,
                                 matmul_dtype=jnp.float32)
    actions_f32 = jax.block_until_ready(actions_f32)
    assert actions_f32.shape == (B, ACTION_DIM)
    assert jnp.allclose(actions_f32, ref, atol=1e-5, rtol=1e-5)

    # Default path: bf16 matmul inputs (native MXU rate on v6e/v7x), f32
    # accumulation / epilogue. Outputs are tanh-saturated -> relaxed tolerance.
    actions = policy_forward(states, params, block_b=128)
    actions = jax.block_until_ready(actions)
    assert actions.shape == (B, ACTION_DIM)
    assert jnp.allclose(actions, ref, atol=5e-2, rtol=0.0)

    print("KERNEL_OK")
</pallas_src>

<mosaic_0001>
module attributes {stable_mosaic.version = 11 : i64} {
  func.func @_policy_fwd_kernel(%arg0: i32, %arg1: memref<16x128xf32, #tpu.memory_space<vmem>>, %arg2: memref<64x16xf32, #tpu.memory_space<vmem>>, %arg3: memref<64x1xf32, #tpu.memory_space<vmem>>, %arg4: memref<64x64xf32, #tpu.memory_space<vmem>>, %arg5: memref<64x1xf32, #tpu.memory_space<vmem>>, %arg6: memref<8x64xf32, #tpu.memory_space<vmem>>, %arg7: memref<8x1xf32, #tpu.memory_space<vmem>>, %arg8: memref<8x128xf32, #tpu.memory_space<vmem>>) attributes {dimension_semantics = [#tpu.dimension_semantics<parallel>], iteration_bounds = array<i64: 2>, scalar_prefetch = 0 : i64, scratch_operands = 0 : i64, tpu.core_type = #tpu.core_type<tc>, window_params = [{transform_indices = @transform_0, window_bounds = array<i64: 16, 128>}, {pipeline_mode = #tpu.pipeline_mode<synchronous>, transform_indices = @transform_1, window_bounds = array<i64: 64, 16>}, {pipeline_mode = #tpu.pipeline_mode<synchronous>, transform_indices = @transform_2, window_bounds = array<i64: 64, 1>}, {pipeline_mode = #tpu.pipeline_mode<synchronous>, transform_indices = @transform_3, window_bounds = array<i64: 64, 64>}, {pipeline_mode = #tpu.pipeline_mode<synchronous>, transform_indices = @transform_4, window_bounds = array<i64: 64, 1>}, {pipeline_mode = #tpu.pipeline_mode<synchronous>, transform_indices = @transform_5, window_bounds = array<i64: 8, 64>}, {pipeline_mode = #tpu.pipeline_mode<synchronous>, transform_indices = @transform_6, window_bounds = array<i64: 8, 1>}, {transform_indices = @transform_7, window_bounds = array<i64: 8, 128>}]} {
    %c0 = arith.constant 0 : index
    %c0_0 = arith.constant 0 : index
    %0 = vector.load %arg1[%c0, %c0_0] : memref<16x128xf32, #tpu.memory_space<vmem>>, vector<16x128xf32>
    %c0_1 = arith.constant 0 : index
    %c0_2 = arith.constant 0 : index
    %1 = vector.load %arg2[%c0_1, %c0_2] : memref<64x16xf32, #tpu.memory_space<vmem>>, vector<64x16xf32>
    %cst = arith.constant dense<0.000000e+00> : vector<64x128xf32>
    %2 = tpu.matmul %1, %0, %cst {dimension_numbers = #tpu.dot_dimension_numbers<[1], [0], [0], [1], [0, 0, 1, 1], [], []>} : vector<64x16xf32>, vector<16x128xf32>, vector<64x128xf32> -> vector<64x128xf32>
    %c0_3 = arith.constant 0 : index
    %c0_4 = arith.constant 0 : index
    %3 = vector.load %arg3[%c0_3, %c0_4] : memref<64x1xf32, #tpu.memory_space<vmem>>, vector<64x1xf32>
    %4 = vector.broadcast %3 : vector<64x1xf32> to vector<64x128xf32>
    %5 = arith.addf %2, %4 : vector<64x128xf32>
    %6 = math.tanh %5 : vector<64x128xf32>
    %c0_5 = arith.constant 0 : index
    %c0_6 = arith.constant 0 : index
    %7 = vector.load %arg4[%c0_5, %c0_6] : memref<64x64xf32, #tpu.memory_space<vmem>>, vector<64x64xf32>
    %cst_7 = arith.constant dense<0.000000e+00> : vector<64x128xf32>
    %8 = tpu.matmul %7, %6, %cst_7 {dimension_numbers = #tpu.dot_dimension_numbers<[1], [0], [0], [1], [0, 0, 1, 1], [], []>} : vector<64x64xf32>, vector<64x128xf32>, vector<64x128xf32> -> vector<64x128xf32>
    %c0_8 = arith.constant 0 : index
    %c0_9 = arith.constant 0 : index
    %9 = vector.load %arg5[%c0_8, %c0_9] : memref<64x1xf32, #tpu.memory_space<vmem>>, vector<64x1xf32>
    %10 = vector.broadcast %9 : vector<64x1xf32> to vector<64x128xf32>
    %11 = arith.addf %8, %10 : vector<64x128xf32>
    %12 = math.tanh %11 : vector<64x128xf32>
    %c0_10 = arith.constant 0 : index
    %c0_11 = arith.constant 0 : index
    %13 = vector.load %arg6[%c0_10, %c0_11] : memref<8x64xf32, #tpu.memory_space<vmem>>, vector<8x64xf32>
    %cst_12 = arith.constant dense<0.000000e+00> : vector<8x128xf32>
    %14 = tpu.matmul %13, %12, %cst_12 {dimension_numbers = #tpu.dot_dimension_numbers<[1], [0], [0], [1], [0, 0, 1, 1], [], []>} : vector<8x64xf32>, vector<64x128xf32>, vector<8x128xf32> -> vector<8x128xf32>
    %c0_13 = arith.constant 0 : index
    %c0_14 = arith.constant 0 : index
    %15 = vector.load %arg7[%c0_13, %c0_14] : memref<8x1xf32, #tpu.memory_space<vmem>>, vector<8x1xf32>
    %16 = vector.broadcast %15 : vector<8x1xf32> to vector<8x128xf32>
    %17 = arith.addf %14, %16 : vector<8x128xf32>
    %18 = math.tanh %17 : vector<8x128xf32>
    %c0_15 = arith.constant 0 : index
    %c0_16 = arith.constant 0 : index
    %19 = vector.load %arg8[%c0_15, %c0_16] : memref<8x128xf32, #tpu.memory_space<vmem>>, vector<8x128xf32>
    tpu.vector_store %arg8[%c0_15, %c0_16], %18 {strides = array<i32>} : memref<8x128xf32, #tpu.memory_space<vmem>>, vector<8x128xf32>,
    return
  }
  func.func @transform_0(%arg0: i32) -> (i32, i32) {
    %c0_i32 = arith.constant 0 : i32
    %c0_i32_0 = arith.constant 0 : i32
    return %c0_i32, %arg0 : i32, i32
  }
  func.func @transform_1(%arg0: i32) -> (i32, i32) {
    %c0_i32 = arith.constant 0 : i32
    %c0_i32_0 = arith.constant 0 : i32
    %c0_i32_1 = arith.constant 0 : i32
    return %c0_i32, %c0_i32_0 : i32, i32
  }
  func.func @transform_2(%arg0: i32) -> (i32, i32) {
    %c0_i32 = arith.constant 0 : i32
    %c0_i32_0 = arith.constant 0 : i32
    %c0_i32_1 = arith.constant 0 : i32
    return %c0_i32, %c0_i32_0 : i32, i32
  }
  func.func @transform_3(%arg0: i32) -> (i32, i32) {
    %c0_i32 = arith.constant 0 : i32
    %c0_i32_0 = arith.constant 0 : i32
    %c0_i32_1 = arith.constant 0 : i32
    return %c0_i32, %c0_i32_0 : i32, i32
  }
  func.func @transform_4(%arg0: i32) -> (i32, i32) {
    %c0_i32 = arith.constant 0 : i32
    %c0_i32_0 = arith.constant 0 : i32
    %c0_i32_1 = arith.constant 0 : i32
    return %c0_i32, %c0_i32_0 : i32, i32
  }
  func.func @transform_5(%arg0: i32) -> (i32, i32) {
    %c0_i32 = arith.constant 0 : i32
    %c0_i32_0 = arith.constant 0 : i32
    %c0_i32_1 = arith.constant 0 : i32
    return %c0_i32, %c0_i32_0 : i32, i32
  }
  func.func @transform_6(%arg0: i32) -> (i32, i32) {
    %c0_i32 = arith.constant 0 : i32
    %c0_i32_0 = arith.constant 0 : i32
    %c0_i32_1 = arith.constant 0 : i32
    return %c0_i32, %c0_i32_0 : i32, i32
  }
  func.func @transform_7(%arg0: i32) -> (i32, i32) {
    %c0_i32 = arith.constant 0 : i32
    %c0_i32_0 = arith.constant 0 : i32
    return %c0_i32, %arg0 : i32, i32
  }
}

</mosaic_0001>

<bundles_post_ra>
// kernel: tpu_custom_call.1
= control target key start
LH: loop header
LB: loop body
LE: loop exit
PB: predicated region body
PF: predicated region fallthrough
CT: control target
= control target key end

     0   :  { %12 = vsyncpa [#allocation4], 0  ;;  %s1442_s0 = inlined_call_operand.vmem [shape: f32[16,256], index: 0, kind: input, shape index: {}]   ;;  %s1443_s1 = inlined_call_operand.vmem [shape: f32[64,16], index: 1, kind: input, shape index: {}]   ;;  %s1444_s2 = inlined_call_operand.vmem [shape: f32[64,1], index: 2, kind: input, shape index: {}]   ;;  %s1445_s3 = inlined_call_operand.vmem [shape: f32[64,64], index: 3, kind: input, shape index: {}]   ;;  %s1446_s4 = inlined_call_operand.vmem [shape: f32[64,1], index: 4, kind: input, shape index: {}]   ;;  %s1447_s5 = inlined_call_operand.vmem [shape: f32[8,64], index: 5, kind: input, shape index: {}]   ;;  %s1448_s6 = inlined_call_operand.vmem [shape: f32[8,1], index: 6, kind: input, shape index: {}]   ;;  %s1449_s7 = inlined_call_operand.hbm [shape: f32[8,256], index: 7, kind: output, shape index: {}]  }
   0x1   :  { %14 = vsyncpa [#allocation4 + $0x1], 0  ;;  %s1213_s24 = smov 0   ;;  %s1215_s25 = smov 0  }
   0x2   :  { %s1217_s26 = smov 0   ;;  %s1219_s27 = smov 0  }
   0x3 LB: > { %s865_s28 = sadd.s32 4294967295, %s1166_s27   ;;  %s866_s29 = sadd.s32 4294967294, %s1166_s27   ;;  %s1166_s27 = sphi %s1219_s27, %s1455_s27   ;;  %s1162_s26 = sphi %s1217_s26, %s1454_s26   ;;  %s1158_s25 = sphi %s1215_s25, %s1453_s25   ;;  %s1154_s24 = sphi %s1213_s24, %s1452_s24  }
   0x4   : > { %s1236_s30 = sadd.s32 1, %s1166_s27   ;;  %s27_s8 = sadd.s32 1, %s1162_s26 }
   0x5   : > { %s24_s9 = ssub.s32 %s1166_s27, %s1236_s30  ;;  %p34_p0 = scmp.ne.s32.totalorder %s1162_s26, %s1158_s25 }
   0x6   : > { %p25_p1 = scmp.eq.s32.totalorder %s24_s9, 0  ;;  %p35_p2 = scmp.eq.s32.totalorder %s1166_s27, 0 }
   0x7   : > { %p190_p3 = scmp.eq.s32.totalorder %s865_s28, 1  ;;  %p195_p4 = scmp.ne.s32.totalorder %s1158_s25, %s1154_s24 }
   0x8   : > { %s1249_s10 = scalar_select %p25_p1, %s1162_s26, %s27_s8  }
   0x9   : > { %p36_p5 = por %p35_p2, %p34_p0  ;;  %p1251_p6 = por %p190_p3, %p34_p0 }
   0xa   : > { %p196_p7 = scmp.eq.s32.totalorder %s866_s29, 1  ;;  %p868_p9 = scmp.ge.s32.totalorder %s1166_s27, 2 }
   0xc   : > { %p1255_p8 = por %p196_p7, %p195_p4  ;;  %230 = sbr.rel (%p868_p9) target bundleno = 26 (0x1a), region = 40 }
  0x13   : > { %233 = sbr.rel (!%p36_p5) target bundleno = 26 (0x1a), region = 44  ;;  %s235_s13 = sand.u32 (%p36_p5), 1, %s1162_s26  }
  0x14   : > { %s870_s14 = sshll.u32 (%p36_p5), %s1166_s27, 3  ;;  %s869_s15 = sshll.u32 (%p36_p5), %s235_s13, 4 }
  0x15   : > { %s239_s18 = scalar_lea.vmem (%p36_p5), %s1442_s0, %s870_s14  ;;  %s237_s19 = scalar_lea.vmem (%p36_p5), [#allocation2], %s869_s15 }
  0x16   : > { %v269_v0 = vld [vmem:[%s239_s18] sm:$0xff] (%p36_p5)  ;;  %v271_v1 = vld [vmem:[%s239_s18 + $0x10] sm:$0xff] (%p36_p5) }
  0x17   : > { %270 = vst [vmem:[%s237_s19] sm:$0xff] (%p36_p5), %v269_v0  ;;  %272 = vst [vmem:[%s237_s19 + $0x8] sm:$0xff] (%p36_p5), %v271_v1 }
  0x1a PF: > { %p871_p10 = scmp.ge.s32.totalorder %s1166_s27, 1  ;;  %p277_p11 = scmp.lt.s32.totalorder %s1166_s27, 3 }
  0x1c   : > { %p278_p12 = pnand %p871_p10, %p277_p11 }
  0x1d   : > { %s1270_s20 = sand.u32 (!%p278_p12), 1, %s1158_s25   ;;  %v317_v2 = vld [vmem:[%s1443_s1] sm:$0xff] (!%p278_p12)  ;;  %vm373_vm0 = vcmask (!%p278_p12), 130048   ;;  %v1168_v3 = vmov (!%p278_p12), 0   ;;  %v326_v8 = vld [vmem:[%s1444_s2 + $0x8] sm:$0xff] (!%p278_p12)  ;;  %v327_v9 = vld [vmem:[%s1444_s2 + $0x10] sm:$0xff] (!%p278_p12) }
  0x1e   : > { %281 = sbr.rel (%p278_p12) target bundleno = 765 (0x2fd), region = 82  ;;  %s872_s23 = sshll.u32 (!%p278_p12), %s1270_s20, 4  ;;  %934 = vmatprep.mubr.msk.f32.mxu0 (!%p278_p12), %vm373_vm0, %v317_v2  ;;  %1068 = vset.pattern.permute.xlu0 (!%p278_p12), %v1168_v3  ;;  %v325_v4 = vld [vmem:[%s1444_s2] sm:$0xff] (!%p278_p12)  ;;  %v328_v10 = vld [vmem:[%s1444_s2 + $0x18] sm:$0xff] (!%p278_p12)  ;;  %v318_v11 = vld [vmem:[%s1443_s1 + $0x8] sm:$0xff] (!%p278_p12)  ;;  %vm567_vm1 = vcmask (!%p278_p12), 523264  }
  0x1f   : > { %1069 = vset.pattern.permute.xlu1 (!%p278_p12), %v1168_v3  ;;  %s286_s9 = scalar_lea.vmem (!%p278_p12), [#allocation2], %s872_s23  ;;  %335 = vperm.xlu0 (!%p278_p12), %1068, %v325_v4   ;;  %v319_v12 = vld [vmem:[%s1443_s1 + $0x10] sm:$0xff] (!%p278_p12)  ;;  %v329_v13 = vld [vmem:[%s1444_s2 + $0x20] sm:$0xff] (!%p278_p12)  ;;  %v330_v14 = vld [vmem:[%s1444_s2 + $0x28] sm:$0xff] (!%p278_p12)  ;;  %vm1170_vm2 = vmmov (!%p278_p12), 0   ;;  %s892_s13 = sshll.u32 (!%p278_p12), %s865_s28, 7 }
  0x20   : > { %v315_v5 = vld [vmem:[%s286_s9] sm:$0xff] (!%p278_p12)  ;;  %v316_v6 = vld [vmem:[%s286_s9 + $0x8] sm:$0xff] (!%p278_p12)  ;;  %345 = vperm.xlu1 (!%p278_p12), %1069, %v327_v9   ;;  %s873_s9 = sshll.u32 (!%p278_p12), %s1270_s20, 3  ;;  %s1398_s18 = scalar_lea.hbm (!%p278_p12), %s1449_s7, %s892_s13 }
  0x21   : > { %v993_v7 = vpack.c.bf16 (!%p278_p12), %v316_v6, %v315_v5  ;;  %v320_v15 = vld [vmem:[%s1443_s1 + $0x18] sm:$0xff] (!%p278_p12)  ;;  %v321_v16 = vld [vmem:[%s1443_s1 + $0x20] sm:$0xff] (!%p278_p12)  ;;  %v331_v17 = vld [vmem:[%s1444_s2 + $0x30] sm:$0xff] (!%p278_p12)  ;;  %s314_s14 = scalar_lea.vmem (!%p278_p12), [#allocation3], %s873_s9  ;;  %s788_s19 = scalar_lea.sflag (!%p278_p12), [#allocation4], %s1270_s20 }
  0x22   : > { %v332_v18 = vld [vmem:[%s1444_s2 + $0x38] sm:$0xff] (!%p278_p12)  ;;  %v322_v19 = vld [vmem:[%s1443_s1 + $0x28] sm:$0xff] (!%p278_p12)  ;;  %v323_v20 = vld [vmem:[%s1443_s1 + $0x30] sm:$0xff] (!%p278_p12)  ;;  %s801_s15 = sshll.u32 (!%p278_p12), %s314_s14, 4  ;;  %s1172_s28 = smov (!%p278_p12), [#allocation3]   ;;  %s1400_s15 = int_to_ptr.vmem [resolvable:$true] %s801_s15 }
  0x23   : > { %994 = vmatprep.subr.bf16.mxu0 (!%p278_p12), %v993_v7  ;;  %340 = vperm.xlu0 (!%p278_p12), %1068, %v326_v8   ;;  %v519_v21 = vld [vmem:[%s1446_s4] sm:$0xff] (!%p278_p12)  ;;  %v520_v22 = vld [vmem:[%s1446_s4 + $0x8] sm:$0xff] (!%p278_p12)  ;;  %v324_v23 = vld [vmem:[%s1443_s1 + $0x38] sm:$0xff] (!%p278_p12)  ;;  %s1104_s21 = scalar_lea.vmem (!%p278_p12), %s1400_s15, 128  ;;  %s1108_s22 = sshll.u32 (!%p278_p12), %s1172_s28, 4  ;;  %s1109_s22 = int_to_ptr.vmem [resolvable:$false] %s1108_s22 }
  0x24   : > { %996 = vmatpush3.bf16.msra.mxu0 (!%p278_p12), %v993_v7  ;;  %350 = vperm.xlu1 (!%p278_p12), %1069, %v328_v10   ;;  %v521_v24 = vld [vmem:[%s1446_s4 + $0x10] sm:$0xff] (!%p278_p12)  ;;  %v522_v25 = vld [vmem:[%s1446_s4 + $0x18] sm:$0xff] (!%p278_p12)  ;;  %v523_v26 = vld [vmem:[%s1446_s4 + $0x20] sm:$0xff] (!%p278_p12)  ;;  %p1105_p13 = scmp.ne.s32.totalorder (!%p278_p12), %s1400_s15, %s1104_s21  ;;  %s1110_s23 = scalar_lea.vmem (!%p278_p12), %s1109_s22, 256 }
  0x25   : > { %v524_v27 = vld [vmem:[%s1446_s4 + $0x28] sm:$0xff]  ;;  %v525_v28 = vld [vmem:[%s1446_s4 + $0x30] sm:$0xff]  ;;  %v526_v29 = vld [vmem:[%s1446_s4 + $0x38] sm:$0xff]  ;;  %p1111_p2 = scmp.lt.s32.totalorder %s1400_s15, %s1109_s22  ;;  %p1112_p3 = scmp.lt.s32.totalorder %s1110_s23, %s1104_s21 }
  0x26   : > { %v706_v30 = vld [vmem:[%s1448_s6] sm:$0xff]  ;;  %v512_v4 = vld [vmem:[%s1445_s3 + $0x8] sm:$0xff]  ;;  %v513_v5 = vld [vmem:[%s1445_s3 + $0x10] sm:$0xff]  ;;  %p1106_p0 = pnand %p1105_p13, %p1251_p6 }
  0x27   : > { %935 = vmatmul.mubr.msk.f32.vlgmr.msra.gmra.mrb[0].mxu0 %vm373_vm0, %v318_v11  ;;  %355 = vperm.xlu0 %1068, %v329_v13   ;;  %v511_v31 = vld [vmem:[%s1445_s3] sm:$0xff]  ;;  %v514_v6 = vld [vmem:[%s1445_s3 + $0x18] sm:$0xff]  ;;  %v516_v8 = vld [vmem:[%s1445_s3 + $0x28] sm:$0xff]  ;;  %v1169_v11 = vmov 0.0|0.0   ;;  %p1113_p4 = por %p1112_p3, %p1111_p2 }
  0x28   : > { %937 = vmatprep.mubr.msk.f32.mxu0 %vm373_vm0, %v319_v12  ;;  %360 = vperm.xlu1 %1069, %v330_v14   ;;  %v515_v7 = vld [vmem:[%s1445_s3 + $0x20] sm:$0xff]  ;;  %v517_v9 = vld [vmem:[%s1445_s3 + $0x30] sm:$0xff]  ;;  %v518_v10 = vld [vmem:[%s1445_s3 + $0x38] sm:$0xff]  ;;  %v1171_v12 = vmov 0.0   ;;  %p1107_p1 = pneg %p1106_p0 }
  0x29   : > { %962 = vmatprep.mubr.msk.f32.mxu1 %vm567_vm1, %v511_v31  ;;  %1013 = vmatprep.subr.bf16.mxu0 %v1169_v11 }
  0x2a   : > { %p1114_p5 = pnand %p1113_p4, %p1107_p1 }
  0x2b   : > { %938 = vmatmul.mubr.msk.f32.gmra.mrb[2].mxu0 %vm373_vm0, %v320_v15  ;;  %365 = vperm.xlu0 %1068, %v331_v17  }
  0x2c   : > { %940 = vmatprep.mubr.msk.f32.mxu0 %vm373_vm0, %v321_v16  ;;  %370 = vperm.xlu1 %1069, %v332_v18  }
  0x2f   : > { %941 = vmatmul.mubr.msk.f32.gmra.mrb[4].mxu0 %vm373_vm0, %v322_v19  ;;  %529 = vperm.xlu0 %1068, %v519_v21  }
  0x30   : > { %943 = vmatprep.mubr.msk.f32.mxu0 %vm373_vm0, %v323_v20  ;;  %534 = vperm.xlu1 %1069, %v520_v22  }
  0x33   : > { %944 = vmatmul.mubr.msk.f32.gmra.mrb[6].mxu0 %vm373_vm0, %v324_v23  ;;  %539 = vperm.xlu0 %1068, %v521_v24  }
  0x34   : > { %544 = vperm.xlu1 %1069, %v522_v25   ;;  %990 = vmatprep.mubr.msk.f32.mxu0 %vm1170_vm2, %v1171_v12 }
  0x37   : > { %549 = vperm.xlu0 %1068, %v523_v26  }
  0x38   : > { %554 = vperm.xlu1 %1069, %v524_v27  }
  0x3b   : > { %559 = vperm.xlu0 %1068, %v525_v28  }
  0x3c   : > { %564 = vperm.xlu1 %1069, %v526_v29  }
  0x3f   : > { %709 = vperm.xlu0 %1068, %v706_v30  }
  0x9e   : > { %v336_v32 = vpop.permute.xlu0 %335 }
  0x9f   : > { %v346_v33 = vpop.permute.xlu1 %345 }
  0xa2   : > { %v341_v34 = vpop.permute.xlu0 %340 }
  0xa3   : > { %v351_v35 = vpop.permute.xlu1 %350 }
  0xa6   : > { %v356_v45 = vpop.permute.xlu0 %355 }
  0xa7   : > { %v361_v43 = vpop.permute.xlu1 %360 }
  0xaa   : > { %v366_v53 = vpop.permute.xlu0 %365 }
  0xab   : > { %v371_v50 = vpop.permute.xlu1 %370 }
  0xae   : > { %v530_v14 = vpop.permute.xlu0 %529 }
  0xaf   : > { %v535_v13 = vpop.permute.xlu1 %534 }
  0xb2   : > { %v540_v17 = vpop.permute.xlu0 %539 }
  0xb3   : > { %v545_v15 = vpop.permute.xlu1 %544 }
  0xb6   : > { %v550_v26 = vpop.permute.xlu0 %549 }
  0xb7   : > { %v555_v24 = vpop.permute.xlu1 %554 }
  0xbb   : > { %v565_v31 = vpop.permute.xlu1 %564 }
  0xfa   : > { %v936_v36 = vpop.f32.mrb[0].mxu0 }
  0xfb   : > { %v470_v37 = vadd.f32 %v936_v36, %v341_v34  ;;  %v464_v38 = vpop.f32.mrb[1].mxu0  ;;  %v560_v34 = vpop.permute.xlu0 %559 }
  0xfc   : > { %v465_v39 = vadd.f32 %v464_v38, %v336_v32 }
  0xfd   : > { %1070 = vtanh.f32 %v470_v37 }
  0xfe   : > { %1072 = vtanh.f32 %v465_v39  ;;  %v939_v40 = vpop.f32.mrb[2].mxu0 }
  0xff   : > { %v480_v41 = vadd.f32 %v939_v40, %v351_v35  ;;  %v474_v42 = vpop.f32.mrb[3].mxu0 }
 0x100   : > { %v475_v44 = vadd.f32 %v474_v42, %v346_v33 }
 0x101   : > { %1074 = vtanh.f32 %v480_v41 }
 0x102   : > { %1076 = vtanh.f32 %v475_v44  ;;  %v942_v46 = vpop.f32.mrb[4].mxu0 }
 0x103   : > { %v490_v47 = vadd.f32 %v942_v46, %v361_v43  ;;  %v484_v48 = vpop.f32.mrb[5].mxu0 }
 0x104   : > { %v485_v49 = vadd.f32 %v484_v48, %v356_v45 }
 0x105   : > { %1078 = vtanh.f32 %v490_v47 }
 0x106   : > { %1080 = vtanh.f32 %v485_v49  ;;  %v945_v51 = vpop.f32.mrb[6].mxu0  ;;  %v705_v49 = vld [vmem:[%s1447_s5] sm:$0xff] }
 0x107   : > { %v1071_v52 = vpop.eup %1070  ;;  %v500_v54 = vadd.f32 %v945_v51, %v371_v50  ;;  %v494_v55 = vpop.f32.mrb[7].mxu0 }
 0x108   : > { %v1073_v56 = vpop.eup %1072  ;;  %v495_v57 = vadd.f32 %v494_v55, %v366_v53  ;;  %v710_v50 = vpop.permute.xlu0 %709 }
 0x109   : > { %1082 = vtanh.f32 %v500_v54  ;;  %v997_v58 = vpack.c.bf16 %v1071_v52, %v1073_v56 }
 0x10a   : > { %1084 = vtanh.f32 %v495_v57 }
 0x10b   : > { %v1075_v59 = vpop.eup %1074  ;;  %998 = vmatprep.subr.bf16.mxu1 %v997_v58 }
 0x10c   : > { %v1077_v60 = vpop.eup %1076  ;;  %1000 = vmatpush3.bf16.msra.mxu1 %v997_v58 }
 0x10d   : > { %v1001_v61 = vpack.c.bf16 %v1075_v59, %v1077_v60 }
 0x10f   : > { %v1079_v62 = vpop.eup %1078  ;;  %1002 = vmatprep.subr.bf16.mxu1 %v1001_v61 }
 0x110   : > { %v1081_v63 = vpop.eup %1080  ;;  %1004 = vmatpush3.bf16.msra.mxu1 %v1001_v61 }
 0x111   : > { %v1005_v0 = vpack.c.bf16 %v1079_v62, %v1081_v63 }
 0x113   : > { %v1083_v1 = vpop.eup %1082  ;;  %1006 = vmatprep.subr.bf16.mxu1 %v1005_v0 }
 0x114   : > { %v1085_v2 = vpop.eup %1084  ;;  %1008 = vmatpush3.bf16.msra.mxu1 %v1005_v0 }
 0x115   : > { %v1009_v3 = vpack.c.bf16 %v1083_v1, %v1085_v2 }
 0x117   : > { %1010 = vmatprep.subr.bf16.mxu1 %v1009_v3 }
 0x118   : > { %1012 = vmatpush3.bf16.msra.mxu1 %v1009_v3 }
 0x11b   : > { %963 = vmatmul.mubr.msk.f32.vlgmr.msra.gmra.mrb[0].mxu1 %vm567_vm1, %v512_v4 }
 0x11c   : > { %965 = vmatprep.mubr.msk.f32.mxu1 %vm567_vm1, %v513_v5 }
 0x11f   : > { %966 = vmatmul.mubr.msk.f32.gmra.mrb[2].mxu1 %vm567_vm1, %v514_v6 }
 0x120   : > { %968 = vmatprep.mubr.msk.f32.mxu1 %vm567_vm1, %v515_v7 }
 0x123   : > { %969 = vmatmul.mubr.msk.f32.gmra.mrb[4].mxu1 %vm567_vm1, %v516_v8 }
 0x124   : > { %971 = vmatprep.mubr.msk.f32.mxu1 %vm567_vm1, %v517_v9 }
 0x127   : > { %972 = vmatmul.mubr.msk.f32.gmra.mrb[6].mxu1 %vm567_vm1, %v518_v10 }
 0x1ee   : > { %v964_v16 = vpop.f32.mrb[0].mxu1 }
 0x1ef   : > { %v664_v18 = vadd.f32 %v964_v16, %v535_v13  ;;  %v658_v19 = vpop.f32.mrb[1].mxu1 }
 0x1f0   : > { %v659_v20 = vadd.f32 %v658_v19, %v530_v14 }
 0x1f1   : > { %1086 = vtanh.f32 %v664_v18 }
 0x1f2   : > { %1088 = vtanh.f32 %v659_v20  ;;  %v967_v21 = vpop.f32.mrb[2].mxu1 }
 0x1f3   : > { %v674_v22 = vadd.f32 %v967_v21, %v545_v15  ;;  %v668_v23 = vpop.f32.mrb[3].mxu1 }
 0x1f4   : > { %v669_v25 = vadd.f32 %v668_v23, %v540_v17 }
 0x1f5   : > { %1090 = vtanh.f32 %v674_v22 }
 0x1f6   : > { %1092 = vtanh.f32 %v669_v25  ;;  %v970_v27 = vpop.f32.mrb[4].mxu1 }
 0x1f7   : > { %v684_v28 = vadd.f32 %v970_v27, %v555_v24  ;;  %v678_v29 = vpop.f32.mrb[5].mxu1 }
 0x1f8   : > { %v679_v30 = vadd.f32 %v678_v29, %v550_v26 }
 0x1f9   : > { %1094 = vtanh.f32 %v684_v28 }
 0x1fa   : > { %1096 = vtanh.f32 %v679_v30  ;;  %v973_v32 = vpop.f32.mrb[6].mxu1 }
 0x1fb   : > { %v1087_v33 = vpop.eup %1086  ;;  %v694_v35 = vadd.f32 %v973_v32, %v565_v31  ;;  %v688_v36 = vpop.f32.mrb[7].mxu1 }
 0x1fc   : > { %v1089_v37 = vpop.eup %1088  ;;  %v689_v38 = vadd.f32 %v688_v36, %v560_v34 }
 0x1fd   : > { %1098 = vtanh.f32 %v694_v35  ;;  %v1014_v39 = vpack.c.bf16 %v1087_v33, %v1089_v37 }
 0x1fe   : > { %1100 = vtanh.f32 %v689_v38 }
 0x1ff   : > { %v1091_v40 = vpop.eup %1090  ;;  %1015 = vmatpush3.bf16.msra.mxu0 %v1014_v39 }
 0x200   : > { %v1093_v41 = vpop.eup %1092  ;;  %1016 = vmatprep.subr.bf16.mxu0 %v1169_v11 }
 0x201   : > { %v1017_v42 = vpack.c.bf16 %v1091_v40, %v1093_v41 }
 0x203   : > { %v1095_v43 = vpop.eup %1094  ;;  %1018 = vmatpush3.bf16.msra.mxu0 %v1017_v42 }
 0x204   : > { %v1097_v44 = vpop.eup %1096  ;;  %1019 = vmatprep.subr.bf16.mxu0 %v1169_v11 }
 0x205   : > { %v1020_v45 = vpack.c.bf16 %v1095_v43, %v1097_v44 }
 0x207   : > { %v1099_v46 = vpop.eup %1098  ;;  %1021 = vmatpush3.bf16.msra.mxu0 %v1020_v45 }
 0x208   : > { %v1101_v47 = vpop.eup %1100  ;;  %1022 = vmatprep.subr.bf16.mxu0 %v1169_v11 }
 0x209   : > { %v1023_v48 = vpack.c.bf16 %v1099_v46, %v1101_v47 }
 0x20b   : > { %1024 = vmatpush3.bf16.msra.mxu0 %v1023_v48 }
 0x20e   : > { %991 = vmatmul.mubr.msk.f32.vlgmr.msra.gmra.mrb[8].mxu0 %vm567_vm1, %v705_v49 }
 0x2e1   : > { %v781_v51 = vpop.f32.mrb[8].mxu0 }
 0x2e2   : > { %v782_v52 = vadd.f32 %v781_v51, %v710_v50  ;;  %v992_v53 = vpop.f32.mrb[9].mxu0 }
 0x2e4   : > { %1102 = vtanh.f32 %v782_v52 }
 0x2ee   : > { %v1103_v54 = vpop.eup %1102 }
 0x2ef   : > { %786 = vst [vmem:[%s314_s14] sm:$0xff] %v1103_v54 }
 0x2f0   : > { %1117 = shalt.err (!%p1114_p5)
}
 0x2f1   : > { %s1118_s20 = scalar_lea.hbm %s1398_s18, 128  ;;  %s1122_s9 = scalar_lea.hbm %s1449_s7, 256 }
 0x2f2   : > { %p1119_p7 = scmp.ne.s32.totalorder %s1398_s18, %s1118_s20  ;;  %p1123_p12 = scmp.lt.u32.totalorder %s1398_s18, %s1449_s7 }
 0x2f3   : > { %p1124_p13 = scmp.lt.u32.totalorder %s1122_s9, %s1118_s20  ;;  %p1126_p1 = scmp.lt.u32.totalorder %s1118_s20, %s1398_s18 }
 0x2f4   : > { %p1120_p10 = pnand %p1119_p7, %p1251_p6 }
 0x2f5   : > { %p1125_p0 = por %p1124_p13, %p1123_p12 }
 0x2f6   : > { %p1121_p11 = pneg %p1120_p10 }
 0x2f7   : > { %p1127_p2 = por %p1126_p1, %p1125_p0 }
 0x2f9   : > { %p1128_p3 = pnand %p1127_p2, %p1121_p11 }
 0x2fb   : > { %1131 = shalt.err (!%p1128_p3)
}
 0x2fc   : > { %1025 = dma.vmem_to_hbm [thread:$0]  (%p1251_p6), %s1400_s15, 128, %s1398_s18, %s788_s19  }
 0x2fd PF: > { %s813_s16 = sand.u32 1, %s1154_s24   ;;  %p1028_p4 = pnand %p868_p9, %p1255_p8 }
 0x2fe   : > { %s814_s17 = scalar_lea.sflag [#allocation4], %s813_s16 }
 0x2ff   : > { %1149 = dma.done.wait (!%p1028_p4), %s814_s17, 128  }
 0x300   : > { %1151 = vsyncadd (!%p1028_p4), %s814_s17, 4294967168  ;;  %p17_p5 = scmp.ge.s32.totalorder %s1236_s30, 4   ;;  %s1452_s24 = smov %s1158_s25 }
 0x301   : > { %s1453_s25 = smov %s1162_s26  ;;  %s1454_s26 = smov %s1249_s10 }
 0x302   : > { %s1455_s27 = smov %s1236_s30  ;;  %19 = sbr.rel (!%p17_p5) target bundleno = 3 (0x3), region = 126 }
 0x309   :  { %819 = vsyncpa [#allocation4], 1 }
 0x30a   :  { %821 = vsyncpa [#allocation4 + $0x1], 1 }

</bundles_post_ra>
